<compile_context>
chip_gen: v5e
topology: v5e:2x2
jax: 0.10.0
libtpu: 0.0.40
codegen_flags: <defaults>
</compile_context>

<pallas_src>
import jax
import jax.numpy as jnp
from jax.experimental import pallas as pl
from jax.experimental.pallas import tpu as pltpu

HIDDEN1 = 128
HIDDEN2 = 64


def _round_up(n, m):
    return ((n + m - 1) // m) * m


def _cdiv(a, b):
    return -(-a // b)


def _choose_batch_tiling(batch, tile_batch):
    """Pick (tile_rows, padded_batch) so tile_rows is a multiple of 8, divides
    padded_batch exactly (minimal padding), and the grid has >= 2 steps when
    there are at least 2 sublane-chunks of rows (v7x megacore)."""
    padded = _round_up(batch, 8)
    chunks = padded // 8
    n_tiles = max(_cdiv(padded, tile_batch), 2 if chunks >= 2 else 1)
    chunks_per_tile = _cdiv(chunks, n_tiles)
    tb = chunks_per_tile * 8
    return tb, tb * n_tiles


def policy_kernel(x_ref, w1_ref, b1_ref, w2_ref, b2_ref, w3_ref, b3_ref, o_ref):
    # x arrives as f32 from HBM; cast to bf16 on the VPU (free, VPU has slack).
    x = x_ref[...].astype(jnp.bfloat16)                               # (TB, S)

    h1 = jnp.dot(x, w1_ref[...], preferred_element_type=jnp.float32) + b1_ref[...]
    h1 = jnp.maximum(h1, 0.0).astype(jnp.bfloat16)                    # (TB, 128)

    h2 = jnp.dot(h1, w2_ref[...], preferred_element_type=jnp.float32) + b2_ref[...]
    h2 = jnp.maximum(h2, 0.0).astype(jnp.bfloat16)                    # (TB, 128) lane-dense (cols 64: are exact zeros)

    out = jnp.dot(h2, w3_ref[...], preferred_element_type=jnp.float32) + b3_ref[...]
    o_ref[...] = out.astype(o_ref.dtype)                              # (TB, padded_actions) f32


def prepare_params(params):
    """One-time preprocessing: bf16 MXU operands, zero-pad fc2 to 128 lanes and
    fc3's action dim to a multiple of 8.  Keep biases f32 for the epilogue."""
    action_size = params["w3"].shape[1]
    padded_actions = _round_up(action_size, 8)

    w1 = params["w1"].astype(jnp.bfloat16)                            # (S, 128)
    b1 = params["b1"].astype(jnp.float32)                             # (1, 128)

    # fc2: pad 64 -> 128 output lanes (exact: ReLU(h1 @ 0 + 0) == 0).
    w2 = jnp.pad(params["w2"], ((0, 0), (0, HIDDEN1 - HIDDEN2))).astype(jnp.bfloat16)   # (128, 128)
    b2 = jnp.pad(params["b2"], ((0, 0), (0, HIDDEN1 - HIDDEN2))).astype(jnp.float32)    # (1, 128)

    # fc3: pad K dim 64 -> 128 with zero rows (contribute nothing) and the
    # action dim up to a multiple of 8 (narrow, lane-legal output block).
    w3 = jnp.pad(
        params["w3"],
        ((0, HIDDEN1 - HIDDEN2), (0, padded_actions - action_size)),
    ).astype(jnp.bfloat16)                                             # (128, padded_actions)
    b3 = jnp.pad(params["b3"], ((0, 0), (0, padded_actions - action_size))).astype(jnp.float32)

    return {
        "w1": w1, "b1": b1,
        "w2": w2, "b2": b2,
        "w3": w3, "b3": b3,
        "action_size": action_size,
    }


def policy_forward(x, prep, *, tile_batch=4096):
    """x: (batch, state_size) float32. prep: output of prepare_params."""
    batch, state_size = x.shape
    action_size = prep["action_size"]
    padded_actions = prep["w3"].shape[1]

    tb, padded_batch = _choose_batch_tiling(batch, tile_batch)
    x_in = x
    if padded_batch != batch:
        # Only taken when batch isn't a clean multiple of 8*n_tiles; the pad is
        # at most a few rows (never a whole tile of dead work).
        x_in = jnp.pad(x, ((0, padded_batch - batch), (0, 0)))

    grid = (padded_batch // tb,)

    # Weights/biases: constant index_map -> resident in VMEM, DMA'd once.
    resident = lambda a: pl.BlockSpec(a.shape, lambda i: (0,) * a.ndim)

    out = pl.pallas_call(
        policy_kernel,
        out_shape=jax.ShapeDtypeStruct((padded_batch, padded_actions), jnp.float32),
        grid=grid,
        in_specs=[
            pl.BlockSpec((tb, state_size), lambda i: (i, 0)),   # streamed f32 x tiles
            resident(prep["w1"]), resident(prep["b1"]),
            resident(prep["w2"]), resident(prep["b2"]),
            resident(prep["w3"]), resident(prep["b3"]),
        ],
        out_specs=pl.BlockSpec((tb, padded_actions), lambda i: (i, 0)),
        compiler_params=pltpu.CompilerParams(
            dimension_semantics=("parallel",),   # lets v7x shard batch across its 2 TCs
        ),
    )(x_in, prep["w1"], prep["b1"], prep["w2"], prep["b2"], prep["w3"], prep["b3"])

    return out[:batch, :action_size]


def init_params(key, state_size, action_size):
    """Deterministic init mimicking nn.Linear's U(-1/sqrt(fan_in), 1/sqrt(fan_in))."""
    sizes = [(state_size, HIDDEN1), (HIDDEN1, HIDDEN2), (HIDDEN2, action_size)]
    params = {}
    for idx, (fan_in, fan_out) in enumerate(sizes, start=1):
        key, kw, kb = jax.random.split(key, 3)
        bound = 1.0 / jnp.sqrt(float(fan_in))
        # stored as (in, out) so the kernel does x @ W (equivalent to x @ W_pt.T)
        params[f"w{idx}"] = jax.random.uniform(
            kw, (fan_in, fan_out), jnp.float32, -bound, bound)
        params[f"b{idx}"] = jax.random.uniform(
            kb, (1, fan_out), jnp.float32, -bound, bound)
    return params


def policy_reference(x, params):
    """Pure-JAX f32 reference for correctness checking."""
    h1 = jnp.maximum(x @ params["w1"] + params["b1"], 0.0)
    h2 = jnp.maximum(h1 @ params["w2"] + params["b2"], 0.0)
    return h2 @ params["w3"] + params["b3"]


if __name__ == "__main__":
    batch = 8
    state_size = 16
    action_size = 4

    key = jax.random.PRNGKey(0)
    key, kx = jax.random.split(key)
    x = jax.random.normal(kx, (batch, state_size), dtype=jnp.float32)
    params = init_params(key, state_size, action_size)
    prep = prepare_params(params)

    out = policy_forward(x, prep)
    out = jax.block_until_ready(out)

    ref = policy_reference(x, params)
    assert out.shape == (batch, action_size)
    # bf16 MXU operands -> loosened tolerance vs. the f32 reference.
    assert jnp.allclose(out, ref, atol=5e-2, rtol=5e-2), "mismatch vs reference"

    print("KERNEL_OK")
</pallas_src>

<mosaic_0001>
module attributes {stable_mosaic.version = 11 : i64} {
  func.func @policy_kernel(%arg0: i32, %arg1: memref<8x16xf32, #tpu.memory_space<vmem>>, %arg2: memref<16x128xbf16, #tpu.memory_space<vmem>>, %arg3: memref<1x128xf32, #tpu.memory_space<vmem>>, %arg4: memref<128x128xbf16, #tpu.memory_space<vmem>>, %arg5: memref<1x128xf32, #tpu.memory_space<vmem>>, %arg6: memref<128x8xbf16, #tpu.memory_space<vmem>>, %arg7: memref<1x8xf32, #tpu.memory_space<vmem>>, %arg8: memref<8x8xf32, #tpu.memory_space<vmem>>) attributes {dimension_semantics = [#tpu.dimension_semantics<parallel>], iteration_bounds = array<i64: 1>, scalar_prefetch = 0 : i64, scratch_operands = 0 : i64, tpu.core_type = #tpu.core_type<tc>, window_params = [{transform_indices = @transform_0, window_bounds = array<i64: 8, 16>}, {pipeline_mode = #tpu.pipeline_mode<synchronous>, transform_indices = @transform_1, window_bounds = array<i64: 16, 128>}, {pipeline_mode = #tpu.pipeline_mode<synchronous>, transform_indices = @transform_2, window_bounds = array<i64: 1, 128>}, {pipeline_mode = #tpu.pipeline_mode<synchronous>, transform_indices = @transform_3, window_bounds = array<i64: 128, 128>}, {pipeline_mode = #tpu.pipeline_mode<synchronous>, transform_indices = @transform_4, window_bounds = array<i64: 1, 128>}, {pipeline_mode = #tpu.pipeline_mode<synchronous>, transform_indices = @transform_5, window_bounds = array<i64: 128, 8>}, {pipeline_mode = #tpu.pipeline_mode<synchronous>, transform_indices = @transform_6, window_bounds = array<i64: 1, 8>}, {transform_indices = @transform_7, window_bounds = array<i64: 8, 8>}]} {
    %c0 = arith.constant 0 : index
    %c0_0 = arith.constant 0 : index
    %0 = vector.load %arg1[%c0, %c0_0] : memref<8x16xf32, #tpu.memory_space<vmem>>, vector<8x16xf32>
    %1 = arith.truncf %0 : vector<8x16xf32> to vector<8x16xbf16>
    %c0_1 = arith.constant 0 : index
    %c0_2 = arith.constant 0 : index
    %2 = vector.load %arg2[%c0_1, %c0_2] : memref<16x128xbf16, #tpu.memory_space<vmem>>, vector<16x128xbf16>
    %cst = arith.constant dense<0.000000e+00> : vector<8x128xf32>
    %3 = tpu.matmul %1, %2, %cst {dimension_numbers = #tpu.dot_dimension_numbers<[1], [0], [0], [1], [0, 0, 1, 1], [], []>} : vector<8x16xbf16>, vector<16x128xbf16>, vector<8x128xf32> -> vector<8x128xf32>
    %c0_3 = arith.constant 0 : index
    %c0_4 = arith.constant 0 : index
    %4 = vector.load %arg3[%c0_3, %c0_4] : memref<1x128xf32, #tpu.memory_space<vmem>>, vector<1x128xf32>
    %5 = vector.broadcast %4 : vector<1x128xf32> to vector<8x128xf32>
    %6 = arith.addf %3, %5 : vector<8x128xf32>
    %cst_5 = arith.constant 0.000000e+00 : f32
    %7 = vector.broadcast %cst_5 : f32 to vector<8x128xf32>
    %8 = arith.maximumf %6, %7 : vector<8x128xf32>
    %9 = arith.truncf %8 : vector<8x128xf32> to vector<8x128xbf16>
    %c0_6 = arith.constant 0 : index
    %c0_7 = arith.constant 0 : index
    %10 = vector.load %arg4[%c0_6, %c0_7] : memref<128x128xbf16, #tpu.memory_space<vmem>>, vector<128x128xbf16>
    %cst_8 = arith.constant dense<0.000000e+00> : vector<8x128xf32>
    %11 = tpu.matmul %9, %10, %cst_8 {dimension_numbers = #tpu.dot_dimension_numbers<[1], [0], [0], [1], [0, 0, 1, 1], [], []>} : vector<8x128xbf16>, vector<128x128xbf16>, vector<8x128xf32> -> vector<8x128xf32>
    %c0_9 = arith.constant 0 : index
    %c0_10 = arith.constant 0 : index
    %12 = vector.load %arg5[%c0_9, %c0_10] : memref<1x128xf32, #tpu.memory_space<vmem>>, vector<1x128xf32>
    %13 = vector.broadcast %12 : vector<1x128xf32> to vector<8x128xf32>
    %14 = arith.addf %11, %13 : vector<8x128xf32>
    %cst_11 = arith.constant 0.000000e+00 : f32
    %15 = vector.broadcast %cst_11 : f32 to vector<8x128xf32>
    %16 = arith.maximumf %14, %15 : vector<8x128xf32>
    %17 = arith.truncf %16 : vector<8x128xf32> to vector<8x128xbf16>
    %c0_12 = arith.constant 0 : index
    %c0_13 = arith.constant 0 : index
    %18 = vector.load %arg6[%c0_12, %c0_13] : memref<128x8xbf16, #tpu.memory_space<vmem>>, vector<128x8xbf16>
    %cst_14 = arith.constant dense<0.000000e+00> : vector<8x8xf32>
    %19 = tpu.matmul %17, %18, %cst_14 {dimension_numbers = #tpu.dot_dimension_numbers<[1], [0], [0], [1], [0, 0, 1, 1], [], []>} : vector<8x128xbf16>, vector<128x8xbf16>, vector<8x8xf32> -> vector<8x8xf32>
    %c0_15 = arith.constant 0 : index
    %c0_16 = arith.constant 0 : index
    %20 = vector.load %arg7[%c0_15, %c0_16] : memref<1x8xf32, #tpu.memory_space<vmem>>, vector<1x8xf32>
    %21 = vector.broadcast %20 : vector<1x8xf32> to vector<8x8xf32>
    %22 = arith.addf %19, %21 : vector<8x8xf32>
    %c0_17 = arith.constant 0 : index
    %c0_18 = arith.constant 0 : index
    %23 = vector.load %arg8[%c0_17, %c0_18] : memref<8x8xf32, #tpu.memory_space<vmem>>, vector<8x8xf32>
    tpu.vector_store %arg8[%c0_17, %c0_18], %22 {strides = array<i32>} : memref<8x8xf32, #tpu.memory_space<vmem>>, vector<8x8xf32>,
    return
  }
  func.func @transform_0(%arg0: i32) -> (i32, i32) {
    %c0_i32 = arith.constant 0 : i32
    %c0_i32_0 = arith.constant 0 : i32
    return %arg0, %c0_i32 : i32, i32
  }
  func.func @transform_1(%arg0: i32) -> (i32, i32) {
    %c0_i32 = arith.constant 0 : i32
    %c0_i32_0 = arith.constant 0 : i32
    %c0_i32_1 = arith.constant 0 : i32
    return %c0_i32, %c0_i32_0 : i32, i32
  }
  func.func @transform_2(%arg0: i32) -> (i32, i32) {
    %c0_i32 = arith.constant 0 : i32
    %c0_i32_0 = arith.constant 0 : i32
    %c0_i32_1 = arith.constant 0 : i32
    return %c0_i32, %c0_i32_0 : i32, i32
  }
  func.func @transform_3(%arg0: i32) -> (i32, i32) {
    %c0_i32 = arith.constant 0 : i32
    %c0_i32_0 = arith.constant 0 : i32
    %c0_i32_1 = arith.constant 0 : i32
    return %c0_i32, %c0_i32_0 : i32, i32
  }
  func.func @transform_4(%arg0: i32) -> (i32, i32) {
    %c0_i32 = arith.constant 0 : i32
    %c0_i32_0 = arith.constant 0 : i32
    %c0_i32_1 = arith.constant 0 : i32
    return %c0_i32, %c0_i32_0 : i32, i32
  }
  func.func @transform_5(%arg0: i32) -> (i32, i32) {
    %c0_i32 = arith.constant 0 : i32
    %c0_i32_0 = arith.constant 0 : i32
    %c0_i32_1 = arith.constant 0 : i32
    return %c0_i32, %c0_i32_0 : i32, i32
  }
  func.func @transform_6(%arg0: i32) -> (i32, i32) {
    %c0_i32 = arith.constant 0 : i32
    %c0_i32_0 = arith.constant 0 : i32
    %c0_i32_1 = arith.constant 0 : i32
    return %c0_i32, %c0_i32_0 : i32, i32
  }
  func.func @transform_7(%arg0: i32) -> (i32, i32) {
    %c0_i32 = arith.constant 0 : i32
    %c0_i32_0 = arith.constant 0 : i32
    return %arg0, %c0_i32 : i32, i32
  }
}

</mosaic_0001>

<bundles_post_ra>
// kernel: tpu_custom_call.1
= control target key start
LH: loop header
LB: loop body
LE: loop exit
PB: predicated region body
PF: predicated region fallthrough
CT: control target
= control target key end

     0   :  { %12 = vsyncpa [#allocation3], 0  ;;  %s558_s0 = inlined_call_operand.hbm [shape: f32[8,16], index: 0, kind: input, shape index: {}]   ;;  %s559_s1 = inlined_call_operand.hbm [shape: bf16[16,128], index: 1, kind: input, shape index: {}]   ;;  %s560_s2 = inlined_call_operand.vmem [shape: f32[1,128], index: 2, kind: input, shape index: {}]   ;;  %s561_s3 = inlined_call_operand.vmem [shape: bf16[128,128], index: 3, kind: input, shape index: {}]   ;;  %s562_s4 = inlined_call_operand.vmem [shape: f32[1,128], index: 4, kind: input, shape index: {}]   ;;  %s563_s5 = inlined_call_operand.vmem [shape: bf16[128,8], index: 5, kind: input, shape index: {}]   ;;  %s564_s6 = inlined_call_operand.vmem [shape: f32[1,8], index: 6, kind: input, shape index: {}]   ;;  %s565_s7 = inlined_call_operand.hbm [shape: f32[8,8], index: 7, kind: output, shape index: {}]  }
   0x1   :  { %13 = vsyncpa [#allocation6], 0 }
   0x2   :  { %14 = vsyncpa [#allocation4], 0  ;;  %s20_s26 = sshll.u32 %s558_s0, 4  ;;  %s447_s27 = smov [#allocation2]   ;;  %s21_s26 = int_to_ptr.hbm [resolvable:$true] %s20_s26 }
   0x3   :  { %s22_s28 = sshll.u32 %s447_s27, 4  ;;  %s30_s8 = sshll.u32 %s559_s1, 4  ;;  %s23_s28 = int_to_ptr.vmem [resolvable:$true] %s22_s28  ;;  %s31_s8 = int_to_ptr.hbm [resolvable:$true] %s30_s8 }
   0x4   :  { %25 = dma.hbm_to_vmem [thread:$0]  %s21_s26, 128, %s23_s28, [#allocation3]  }
   0x5   :  { %s448_s9 = smov [#allocation5]   ;;  %s449_s11 = smov 64  }
   0x6   :  { %s32_s10 = sshll.u32 %s448_s9, 4  ;;  %s450_s12 = smov 4   ;;  %s33_s10 = int_to_ptr.vmem [resolvable:$true] %s32_s10 }
   0x7   :  { %38 = dma.hbm_to_vmem [thread:$0]  %s31_s8, 128, %s33_s10, [#allocation6], %s449_s11, %s449_s11, %s450_s12  }
   0x8   :  { %441 = dma.done.wait [#allocation3], 128  }
   0x9   :  { %442 = vsyncadd [#allocation3], 4294967168 }
   0xa   :  { %443 = dma.done.wait [#allocation6], 128  }
   0xb   :  { %444 = vsyncadd [#allocation6], 4294967168  ;;  %v344_v0 = vld [vmem:[#allocation5] sm:$0xff]  ;;  %v58_v1 = vld [vmem:[#allocation2] sm:$0xff]  ;;  %vm72_vm0 = vcmask 130048   ;;  %s451_s22 = smov [#allocation7]  }
   0xc   :  { %v352_v2 = vld [vmem:[%s561_s3 + $0x38] sm:$0xff]  ;;  %v59_v3 = vpack.c.bf16 %v58_v1, %v58_v1  ;;  %83 = vmatpush.bf16.msra.mxu0 %v344_v0  ;;  %v351_v4 = vld [vmem:[%s561_s3 + $0x30] sm:$0xff]  ;;  %v350_v5 = vld [vmem:[%s561_s3 + $0x28] sm:$0xff]  ;;  %s262_s23 = sshll.u32 %s451_s22, 4  ;;  %vm255_vm1 = vcmask 64512   ;;  %s263_s23 = int_to_ptr.vmem [resolvable:$true] %s262_s23 }
   0xd   :  { %159 = vmatpush.bf16.msra.mxu1 %v352_v2  ;;  %v349_v6 = vld [vmem:[%s561_s3 + $0x20] sm:$0xff]  ;;  %v348_v7 = vld [vmem:[%s561_s3 + $0x18] sm:$0xff]  ;;  %v347_v8 = vld [vmem:[%s561_s3 + $0x10] sm:$0xff] }
   0xe   :  { %v346_v9 = vld [vmem:[%s561_s3 + $0x8] sm:$0xff]  ;;  %v345_v10 = vld [vmem:[%s561_s3] sm:$0xff]  ;;  %v360_v11 = vld [vmem:[%s563_s5 + $0x38] sm:$0xff] }
   0xf   :  { %279 = vmatmul.msk.bf16.vlgmr.msra.gmra.mxu0 %vm72_vm0, %v59_v3  ;;  %242 = vmatpush.bf16.msra.mxu2 %v360_v11  ;;  %v359_v12 = vld [vmem:[%s563_s5 + $0x30] sm:$0xff]  ;;  %v358_v13 = vld [vmem:[%s563_s5 + $0x28] sm:$0xff]  ;;  %v357_v14 = vld [vmem:[%s563_s5 + $0x20] sm:$0xff] }
  0x10   :  { %v356_v15 = vld [vmem:[%s563_s5 + $0x18] sm:$0xff]  ;;  %v355_v16 = vld [vmem:[%s563_s5 + $0x10] sm:$0xff]  ;;  %v366_v17 = vld [vmem:[%s560_s2] ss:$0 sm:$0xff] }
  0x11   :  { %160 = vmatpush.bf16.msra.mxu1 %v351_v4  ;;  %v354_v23 = vld [vmem:[%s563_s5 + $0x8] sm:$0xff]  ;;  %v353_v24 = vld [vmem:[%s563_s5] sm:$0xff]  ;;  %s264_s5 = sshll.u32 %s565_s7, 4  ;;  %s265_s5 = int_to_ptr.hbm [resolvable:$true] %s264_s5 }
  0x12   :  { %v367_v25 = vld [vmem:[%s562_s4] ss:$0 sm:$0xff] }
  0x13   :  { %243 = vmatpush.bf16.msra.mxu2 %v359_v12  ;;  %v368_v31 = vld [vmem:[%s564_s6] ss:$0 sm:$0xff] }
  0x15   :  { %161 = vmatpush.bf16.msra.mxu1 %v350_v5 }
  0x17   :  { %244 = vmatpush.bf16.msra.mxu2 %v358_v13 }
  0x19   :  { %162 = vmatpush.bf16.msra.mxu1 %v349_v6 }
  0x1b   :  { %245 = vmatpush.bf16.msra.mxu2 %v357_v14 }
  0x1d   :  { %163 = vmatpush.bf16.msra.mxu1 %v348_v7 }
  0x1f   :  { %246 = vmatpush.bf16.msra.mxu2 %v356_v15 }
  0x21   :  { %164 = vmatpush.bf16.msra.mxu1 %v347_v8 }
  0x23   :  { %247 = vmatpush.bf16.msra.mxu2 %v355_v16 }
  0x25   :  { %165 = vmatpush.bf16.msra.mxu1 %v346_v9 }
  0x27   :  { %248 = vmatpush.bf16.msra.mxu2 %v354_v23 }
  0x29   :  { %166 = vmatpush.bf16.msra.mxu1 %v345_v10 }
  0x2b   :  { %249 = vmatpush.bf16.msra.mxu2 %v353_v24 }
  0x8c   :  { %v85_v18 = vpop.f32.mrf.mxu0 }
  0x8d   :  { %v86_v19 = vadd.f32 %v366_v17, %v85_v18 }
  0x8f   :  { %v89_v20 = vmax.f32 %v86_v19, 0.0 }
  0x91   :  { %v90_v21 = vpack.c.bf16 %v89_v20, %v89_v20 }
  0x93   :  { %167 = vmatmul.bf16.vlgmr.msra.gmra.mxu1 %v90_v21 }
  0x94   :  { %v87_v22 = vpop.f32.mrf.mxu0 }
 0x110   :  { %v168_v26 = vpop.f32.mrf.mxu1 }
 0x111   :  { %v169_v27 = vadd.f32 %v367_v25, %v168_v26 }
 0x113   :  { %v172_v28 = vmax.f32 %v169_v27, 0.0 }
 0x115   :  { %v173_v29 = vpack.c.bf16 %v172_v28, %v172_v28 }
 0x117   :  { %250 = vmatmul.bf16.vlgmr.msra.gmra.mxu2 %v173_v29 }
 0x118   :  { %v170_v30 = vpop.f32.mrf.mxu1 }
 0x19a   :  { %v251_v32 = vpop.f32.mrf.mxu2 }
 0x19b   :  { %v252_v33 = vadd.f32 %v368_v31, %v251_v32 }
 0x19d   :  { %256 = vst.msk [vmem:[#allocation7] sm:$0xff] %vm255_vm1, %v252_v33 }
 0x19e   :  { %267 = dma.vmem_to_hbm [thread:$0]  %s263_s23, 128, %s265_s5, [#allocation4]  }
 0x1a2   :  { %v253_v34 = vpop.f32.mrf.mxu2 }
 0x1a3   :  { %445 = dma.done.wait [#allocation4], 128  }
 0x1a4   :  { %446 = vsyncadd [#allocation4], 4294967168 }
 0x1a5   :  { %272 = vsyncpa [#allocation3], 1 }
 0x1a6   :  { %273 = vsyncpa [#allocation6], 1 }
 0x1a7   :  { %274 = vsyncpa [#allocation4], 1 }

</bundles_post_ra>
